<compile_context>
chip_gen: v6e
topology: v6e:2x2x1
jax: 0.10.0
libtpu: 0.0.40
codegen_flags: <defaults>
</compile_context>

<pallas_src>
import functools
import math

import numpy as np
import jax
import jax.numpy as jnp
from jax.experimental import pallas as pl
from jax.experimental.pallas import tpu as pltpu


# ----------------------------------------------------------------------------
# helpers
# ----------------------------------------------------------------------------
def _round_up(x, m):
    return ((x + m - 1) // m) * m


def _gelu_erf(x):
    # Exact-erf GELU evaluated in-kernel.  erf uses the Abramowitz & Stegun
    # 7.1.26 rational approximation (|err| < 1.5e-7 in f32) built only from
    # ops guaranteed to lower in Mosaic (abs / exp / mul / where).
    # TODO(synk): switch to lax.erf if its Mosaic lowering is guaranteed.
    z = x * 0.7071067811865476
    az = jnp.abs(z)
    t = 1.0 / (1.0 + 0.3275911 * az)
    poly = ((((1.061405429 * t - 1.453152027) * t + 1.421413741) * t
             - 0.284496736) * t + 0.254829592) * t
    erf_abs = 1.0 - poly * jnp.exp(-az * az)
    erf = jnp.where(z >= 0.0, erf_abs, -erf_abs)
    return 0.5 * x * (1.0 + erf)


# ----------------------------------------------------------------------------
# Pallas kernels
# ----------------------------------------------------------------------------
def _matmul_bias_kernel(a_ref, b_ref, bias_ref, o_ref, acc_ref, *, activation):
    @pl.when(pl.program_id(2) == 0)
    def _():
        acc_ref[...] = jnp.zeros_like(acc_ref)

    acc_ref[...] += jnp.dot(a_ref[...], b_ref[...],
                            preferred_element_type=jnp.float32)

    @pl.when(pl.program_id(2) == pl.num_programs(2) - 1)
    def _():
        r = acc_ref[...] + bias_ref[...]
        if activation == "gelu":
            r = _gelu_erf(r)
        o_ref[...] = r.astype(o_ref.dtype)


def _matmul_nobias_kernel(a_ref, b_ref, o_ref, acc_ref, *, activation):
    @pl.when(pl.program_id(2) == 0)
    def _():
        acc_ref[...] = jnp.zeros_like(acc_ref)

    acc_ref[...] += jnp.dot(a_ref[...], b_ref[...],
                            preferred_element_type=jnp.float32)

    @pl.when(pl.program_id(2) == pl.num_programs(2) - 1)
    def _():
        r = acc_ref[...]
        if activation == "gelu":
            r = _gelu_erf(r)
        o_ref[...] = r.astype(o_ref.dtype)


def pallas_matmul(a, b, bias=None, activation=None, out_dtype=jnp.float32):
    """out = act(a @ b + bias).  bf16 MXU inputs, f32 accumulation, tiled grid,
    lane-dense (128-padded) output slab sliced back to (M, N)."""
    M, K = a.shape
    K2, N = b.shape
    assert K == K2
    a = a.astype(jnp.bfloat16)
    b = b.astype(jnp.bfloat16)

    # MXU-aligned tiles, lane-dense on N/K; capped so double-buffered tiles +
    # accumulator stay well under every chip's scoped VMEM (v5e..v7x).
    tm = min(_round_up(M, 16), 256)
    tk = min(_round_up(K, 128), 512)
    tn = min(_round_up(N, 128), 256)
    Mp, Kp, Np = _round_up(M, tm), _round_up(K, tk), _round_up(N, tn)
    if (Mp, Kp) != (M, K):
        a = jnp.pad(a, ((0, Mp - M), (0, Kp - K)))
    if (Kp, Np) != (K, N):
        b = jnp.pad(b, ((0, Kp - K), (0, Np - N)))

    grid = (Mp // tm, Np // tn, Kp // tk)
    in_specs = [pl.BlockSpec((tm, tk), lambda i, j, k: (i, k)),
                pl.BlockSpec((tk, tn), lambda i, j, k: (k, j))]
    args = [a, b]
    if bias is not None:
        bias_p = jnp.asarray(bias, jnp.float32).reshape(1, N)
        if Np != N:
            bias_p = jnp.pad(bias_p, ((0, 0), (0, Np - N)))
        in_specs.append(pl.BlockSpec((1, tn), lambda i, j, k: (0, j)))
        args.append(bias_p)
        kern = functools.partial(_matmul_bias_kernel, activation=activation)
    else:
        kern = functools.partial(_matmul_nobias_kernel, activation=activation)

    out = pl.pallas_call(
        kern,
        grid=grid,
        in_specs=in_specs,
        out_specs=pl.BlockSpec((tm, tn), lambda i, j, k: (i, j)),
        out_shape=jax.ShapeDtypeStruct((Mp, Np), out_dtype),
        scratch_shapes=[pltpu.VMEM((tm, tn), jnp.float32)],
        compiler_params=pltpu.CompilerParams(
            dimension_semantics=("parallel", "parallel", "arbitrary"),
            vmem_limit_bytes=32 * 1024 * 1024),
    )(*args)
    return out[:M, :N]


def _scale_combine_ln_kernel(xs_ref, scw_ref, scb_ref, psum_ref, x_ref,
                             g_ref, b_ref, o_ref, *, pc, n_scales):
    # Depthwise (n_scales,1) conv: wres[m,c] = sum_h xs[h,m,c]*w[h,c] + b[c].
    # xs is laid out [n_scales, M, C] so each per-scale slice is a cheap
    # leading-dim index.
    acc = xs_ref[0] * scw_ref[0]
    for h in range(1, n_scales):
        acc = acc + xs_ref[h] * scw_ref[h]
    wres = acc + scb_ref[...]
    # WFTNet combine + residual add
    y = (1.0 - pc) * wres + pc * psum_ref[...] + x_ref[...]
    # shared LayerNorm (eps = 1e-5)
    mu = jnp.mean(y, axis=-1, keepdims=True)
    yc = y - mu
    var = jnp.mean(yc * yc, axis=-1, keepdims=True)
    o_ref[...] = yc * jax.lax.rsqrt(var + 1e-5) * g_ref[...] + b_ref[...]


def pallas_scale_combine_ln(xs, psum, resid, sc_w, sc_b, gamma, beta, pc):
    """Fused scale_conv + (1-pc)/pc combine + residual + LayerNorm, row-tiled.

    xs:    [n_scales, M, C]   wavelet-branch conv output
    psum:  [M, C]             softmax-weighted period sum
    resid: [M, C]             layer input (residual)
    """
    S, M, C = xs.shape
    tm = min(_round_up(M, 8), 512)
    Mp = _round_up(M, tm)

    xs = xs.astype(jnp.float32)
    psum = psum.astype(jnp.float32)
    resid = resid.astype(jnp.float32)
    if Mp != M:
        xs = jnp.pad(xs, ((0, 0), (0, Mp - M), (0, 0)))
        psum = jnp.pad(psum, ((0, Mp - M), (0, 0)))
        resid = jnp.pad(resid, ((0, Mp - M), (0, 0)))

    kern = functools.partial(_scale_combine_ln_kernel, pc=float(pc), n_scales=S)
    out = pl.pallas_call(
        kern,
        grid=(Mp // tm,),
        in_specs=[pl.BlockSpec((S, tm, C), lambda i: (0, i, 0)),
                  pl.BlockSpec((S, 1, C), lambda i: (0, 0, 0)),
                  pl.BlockSpec((1, C), lambda i: (0, 0)),
                  pl.BlockSpec((tm, C), lambda i: (i, 0)),
                  pl.BlockSpec((tm, C), lambda i: (i, 0)),
                  pl.BlockSpec((1, C), lambda i: (0, 0)),
                  pl.BlockSpec((1, C), lambda i: (0, 0))],
        out_specs=pl.BlockSpec((tm, C), lambda i: (i, 0)),
        out_shape=jax.ShapeDtypeStruct((Mp, C), jnp.float32),
        compiler_params=pltpu.CompilerParams(
            dimension_semantics=("parallel",)),
    )(xs,
      jnp.asarray(sc_w, jnp.float32).reshape(S, 1, C),
      jnp.asarray(sc_b, jnp.float32).reshape(1, C),
      psum,
      resid,
      gamma.reshape(1, C).astype(jnp.float32),
      beta.reshape(1, C).astype(jnp.float32))
    return out[:M]


# ----------------------------------------------------------------------------
# Deterministic parameter / constant construction (glue)
# ----------------------------------------------------------------------------
def build_positional_embedding(max_len, d_model):
    pe = np.zeros((max_len, d_model), np.float32)
    position = np.arange(0, max_len, dtype=np.float32)[:, None]
    div_term = np.exp(np.arange(0, d_model, 2, dtype=np.float32)
                      * -(math.log(10000.0) / d_model))
    pe[:, 0::2] = np.sin(position * div_term)
    pe[:, 1::2] = np.cos(position * div_term)
    return jnp.asarray(pe[None])  # [1, max_len, d_model]


def build_cwt_matrix(T, wavelet_scale, n_scales=8, precision=10):
    """pywt/ptwt CWT ('morl') expressed as a [T, n_scales*T] matrix so the
    whole continuous wavelet transform becomes one Pallas matmul."""
    scales = 2.0 ** np.linspace(-1, wavelet_scale, n_scales)
    n = 2 ** precision
    x = np.linspace(-8.0, 8.0, n)
    psi = np.exp(-x ** 2 / 2.0) * np.cos(5.0 * x)          # Morlet ('morl')
    step = x[1] - x[0]
    int_psi = np.cumsum(psi) * step                         # integrate_wavelet
    mats = []
    for s in scales:
        j = np.arange(s * (x[-1] - x[0]) + 1) / (s * step)
        j = j.astype(np.int64)
        j = j[j < int_psi.size]
        ker = int_psi[j][::-1]
        L = ker.size
        conv_len = T + L - 1
        coef_len = conv_len - 1
        d = (coef_len - T) / 2.0
        lo = int(np.floor(d)) if d > 0 else 0
        C = np.zeros((T, T), dtype=np.float64)
        for m in range(T):
            for t in range(T):
                i1, i0 = t + lo + 1 - m, t + lo - m
                v1 = ker[i1] if 0 <= i1 < L else 0.0
                v0 = ker[i0] if 0 <= i0 < L else 0.0
                C[m, t] = -np.sqrt(s) * (v1 - v0)
        mats.append(C)
    return jnp.asarray(np.concatenate(mats, axis=1), dtype=jnp.float32), n_scales


def init_params(cfg, key):
    L, P = cfg['seq_len'], cfg['pred_len']
    T = L + P
    dm, dff = cfg['d_model'], cfg['d_ff']
    cin, cout, nk = cfg['enc_in'], cfg['c_out'], cfg['num_kernels']
    keys = iter(jax.random.split(key, 64))

    def nrm(shape, std):
        return std * jax.random.normal(next(keys), shape, jnp.float32)

    params = {}
    # TokenEmbedding Conv1d weight [d_model, enc_in, 3] (kaiming-like, no bias),
    # stored pre-reshaped/transposed and pre-cast to bf16 for the MXU.
    tok_w = nrm((dm, cin, 3), math.sqrt(2.0 / (cin * 3)))
    params['tok_w2d'] = tok_w.reshape(dm, cin * 3).T.astype(jnp.bfloat16)
    params['pe'] = build_positional_embedding(max(128, L), dm)
    # predict_linear: Linear(seq_len -> seq_len + pred_len)
    params['pl_wT'] = nrm((T, L), 1.0 / math.sqrt(L)).T.astype(jnp.bfloat16)
    params['pl_b'] = nrm((T,), 1.0 / math.sqrt(L))
    # final projection: Linear(d_model -> c_out)
    params['proj_wT'] = nrm((cout, dm), 1.0 / math.sqrt(dm)).T.astype(jnp.bfloat16)
    params['proj_b'] = nrm((cout,), 1.0 / math.sqrt(dm))
    # shared LayerNorm
    params['ln_g'] = jnp.ones((dm,), jnp.float32)
    params['ln_b'] = jnp.zeros((dm,), jnp.float32)
    cwt, n_scales = build_cwt_matrix(T, cfg['wavelet_scale'])
    params['cwt_mat'] = cwt.astype(jnp.bfloat16)
    params['n_scales'] = n_scales

    def inception(ci, co):
        # nk convs (k = 2i+1) averaged  ==  one matmul with concatenated,
        # 1/nk-scaled weights; biases are constant-0 per the torch init.
        mats = []
        for i in range(nk):
            kk = 2 * i + 1
            w = nrm((co, ci, kk, kk), math.sqrt(2.0 / (co * kk * kk)))
            mats.append(w.reshape(co, -1).T)            # [ci*kk*kk, co]
        W = (jnp.concatenate(mats, axis=0) / nk).astype(jnp.bfloat16)
        return W, jnp.zeros((co,), jnp.float32)

    layers = []
    for _ in range(cfg['e_layers']):
        lp = {}
        lp['inc1_W'], lp['inc1_b'] = inception(dm, dff)
        lp['inc2_W'], lp['inc2_b'] = inception(dff, dm)
        # scale_conv: Conv2d(dm, dm, (8,1), groups=dm); weight stored as [8, dm]
        lp['sc_w'] = nrm((n_scales, dm), 1.0 / math.sqrt(n_scales))
        lp['sc_b'] = nrm((dm,), 1.0 / math.sqrt(n_scales))
        layers.append(lp)
    params['layers'] = layers
    return params


# ----------------------------------------------------------------------------
# Model forward (glue + Pallas calls)
# ----------------------------------------------------------------------------
def inception_im2col(u, nk):
    """u: NCHW [B,C,H,W] -> bf16 patches [B*H*W, sum_i C*(2i+1)^2] (same pad)."""
    B, C, H, W = u.shape
    u = u.astype(jnp.bfloat16)
    cols = []
    for i in range(nk):
        kk = 2 * i + 1
        up = jnp.pad(u, ((0, 0), (0, 0), (i, i), (i, i)))
        sl = [up[:, :, kh:kh + H, kw:kw + W] for kh in range(kk) for kw in range(kk)]
        p = jnp.stack(sl, axis=-1)                                   # [B,C,H,W,kk*kk]
        cols.append(p.transpose(0, 2, 3, 1, 4).reshape(B, H, W, C * kk * kk))
    return jnp.concatenate(cols, axis=-1).reshape(B * H * W, -1)


def period_conv_batched(branches, lp, nk):
    """Inception(dm->dff) -> fused exact-erf GELU -> Inception(dff->dm) applied
    to every branch with ONE batched (row-concatenated) Pallas matmul per stage."""
    shapes = [t.shape for t in branches]
    cols = [inception_im2col(t, nk) for t in branches]
    sizes = [c.shape[0] for c in cols]
    h1 = pallas_matmul(jnp.concatenate(cols, axis=0), lp['inc1_W'], lp['inc1_b'],
                       activation="gelu", out_dtype=jnp.bfloat16)
    mids, off = [], 0
    for (B, C, H, W), sz in zip(shapes, sizes):
        mids.append(h1[off:off + sz].reshape(B, H, W, -1).transpose(0, 3, 1, 2))
        off += sz
    cols2 = [inception_im2col(t, nk) for t in mids]
    h2 = pallas_matmul(jnp.concatenate(cols2, axis=0), lp['inc2_W'], lp['inc2_b'])
    outs, off = [], 0
    for (B, C, H, W), sz in zip(shapes, sizes):
        outs.append(h2[off:off + sz].reshape(B, H, W, -1).transpose(0, 3, 1, 2))
        off += sz
    return outs


def wavelet_block(x, lp, cwt_mat, n_scales, cfg):
    """Returns (xs, psum): wavelet-branch conv output laid out [8, B*T, dm] for
    the fused scale-conv/combine/LN kernel, and the softmax-weighted period sum."""
    B, T, N = x.shape
    k = cfg['top_k']
    nk = cfg['num_kernels']

    # FFT_for_Period — host-side top-k mirrors torch's .detach().cpu().numpy();
    # TODO(synk): data-dependent reshape lengths force this per-layer host sync
    #             and keep the forward un-jittable end to end (as in torch).
    xf = jnp.fft.rfft(x, axis=1)
    amp = jnp.abs(xf)
    freq = amp.mean(axis=0).mean(axis=-1)
    freq = freq.at[0].set(0.0)
    freq_np = np.asarray(jax.device_get(freq))
    top_list = np.argsort(-freq_np, kind="stable")[:k]
    periods = [int(T // int(i)) if int(i) > 0 else T for i in top_list]
    period_weight = amp.mean(axis=-1)[:, jnp.asarray(top_list)]      # [B, k]

    # Build NCHW inputs for every branch: k period foldings + the CWT branch.
    branches, lengths = [], []
    for p in periods:
        length = T if T % p == 0 else (T // p + 1) * p
        out = x if length == T else jnp.concatenate(
            [x, jnp.zeros((B, length - T, N), x.dtype)], axis=1)
        branches.append(out.reshape(B, length // p, p, N).transpose(0, 3, 1, 2))
        lengths.append(length)
    # CWT == one Pallas matmul against the precomputed wavelet matrix.
    x_bn = x.transpose(0, 2, 1).reshape(B * N, T)
    coeffs = pallas_matmul(x_bn, cwt_mat).reshape(B, N, n_scales, T)  # [B,N,8,T]
    branches.append(coeffs)

    outs = period_conv_batched(branches, lp, nk)

    # Period branch: softmax(amp)-weighted sum across the k periods (glue).
    res_list = []
    for i in range(k):
        u, length = outs[i], lengths[i]
        res_list.append(u.transpose(0, 2, 3, 1).reshape(B, length, N)[:, :T, :])
    res = jnp.stack(res_list, axis=-1)                               # [B,T,N,k]
    pw = jax.nn.softmax(period_weight, axis=1)[:, None, None, :]
    psum = jnp.sum(res * pw, axis=-1)                                # [B,T,N]

    # Wavelet branch laid out [n_scales, B*T, dm] for the fused kernel
    # (leading-dim indexing in-kernel is a cheap static offset).
    xs = outs[-1].transpose(2, 0, 3, 1).reshape(n_scales, B * T, N)
    return xs, psum


def wftnet_forward(params, x, cfg):
    B, L, Cin = x.shape
    T = cfg['seq_len'] + cfg['pred_len']
    dm = cfg['d_model']

    # instance normalization (reference forecast() never de-normalizes)
    means = x.mean(axis=1, keepdims=True)
    xz = x - means
    var = (xz * xz).mean(axis=1, keepdims=True)
    xz = xz / jnp.sqrt(var + 1e-5)

    # DataEmbedding: circular Conv1d (k=3) via im2col + Pallas matmul, + PE;
    # dropout = identity (eval mode).
    xc = xz.transpose(0, 2, 1)                                        # [B,Cin,L]
    xpad = jnp.concatenate([xc[:, :, -1:], xc, xc[:, :, :1]], axis=2)
    pat = jnp.stack([xpad[:, :, kk:kk + L] for kk in range(3)], axis=-1)
    pat = pat.transpose(0, 2, 1, 3).reshape(B * L, Cin * 3)
    emb = pallas_matmul(pat, params['tok_w2d'])
    emb = emb.reshape(B, L, dm) + params['pe'][:, :L, :]

    # predict_linear over the time axis: seq_len -> seq_len + pred_len
    h = emb.transpose(0, 2, 1).reshape(B * dm, L)
    h = pallas_matmul(h, params['pl_wT'], params['pl_b'])
    enc = h.reshape(B, dm, T).transpose(0, 2, 1)                      # [B,T,dm]

    for lp in params['layers']:
        xs, psum = wavelet_block(enc, lp, params['cwt_mat'],
                                 params['n_scales'], cfg)
        enc = pallas_scale_combine_ln(
            xs, psum.reshape(B * T, dm), enc.reshape(B * T, dm),
            lp['sc_w'], lp['sc_b'], params['ln_g'], params['ln_b'],
            cfg['period_coeff']).reshape(B, T, dm)

    dec = pallas_matmul(enc.reshape(B * T, dm), params['proj_wT'],
                        params['proj_b']).reshape(B, T, cfg['c_out'])
    return dec[:, -cfg['pred_len']:, :]


# ----------------------------------------------------------------------------
if __name__ == "__main__":
    cfg = dict(seq_len=16, pred_len=8, enc_in=4, c_out=4, d_model=16, d_ff=32,
               e_layers=1, top_k=2, num_kernels=2, period_coeff=0.5,
               wavelet_scale=4)
    key = jax.random.PRNGKey(0)
    pkey, xkey = jax.random.split(key)
    params = init_params(cfg, pkey)
    x = jax.random.normal(xkey, (2, cfg['seq_len'], cfg['enc_in']), jnp.float32)

    out = wftnet_forward(params, x, cfg)
    out = jax.block_until_ready(out)
    assert out.shape == (2, cfg['pred_len'], cfg['c_out'])
    assert bool(jnp.all(jnp.isfinite(out)))
    print("KERNEL_OK")
</pallas_src>

<mosaic_0001>
module attributes {stable_mosaic.version = 11 : i64} {
  func.func @_matmul_nobias_kernel(%arg0: i32, %arg1: i32, %arg2: i32, %arg3: memref<32x128xbf16, #tpu.memory_space<vmem>>, %arg4: memref<128x128xbf16, #tpu.memory_space<vmem>>, %arg5: memref<32x128xf32, #tpu.memory_space<vmem>>, %arg6: memref<32x128xf32, #tpu.memory_space<vmem>>) attributes {dimension_semantics = [#tpu.dimension_semantics<parallel>, #tpu.dimension_semantics<parallel>, #tpu.dimension_semantics<arbitrary>], iteration_bounds = array<i64: 1, 1, 1>, scalar_prefetch = 0 : i64, scratch_operands = 1 : i64, tpu.core_type = #tpu.core_type<tc>, window_params = [{transform_indices = @transform_0, window_bounds = array<i64: 32, 128>}, {transform_indices = @transform_1, window_bounds = array<i64: 128, 128>}, {transform_indices = @transform_2, window_bounds = array<i64: 32, 128>}]} {
    %c0_i32 = arith.constant 0 : i32
    %0 = arith.cmpi eq, %arg2, %c0_i32 : i32
    %1 = arith.extui %0 : i1 to i32
    %c0_i32_0 = arith.constant 0 : i32
    %2 = arith.cmpi ne, %1, %c0_i32_0 : i32
    scf.if %2 {
      %cst_10 = arith.constant 0.000000e+00 : f32
      %12 = vector.broadcast %cst_10 : f32 to vector<32x128xf32>
      %c0_11 = arith.constant 0 : index
      %c0_12 = arith.constant 0 : index
      %13 = vector.load %arg6[%c0_11, %c0_12] : memref<32x128xf32, #tpu.memory_space<vmem>>, vector<32x128xf32>
      tpu.vector_store %arg6[%c0_11, %c0_12], %12 {strides = array<i32>} : memref<32x128xf32, #tpu.memory_space<vmem>>, vector<32x128xf32>,
    } else {
    }
    %c0 = arith.constant 0 : index
    %c0_1 = arith.constant 0 : index
    %3 = vector.load %arg6[%c0, %c0_1] : memref<32x128xf32, #tpu.memory_space<vmem>>, vector<32x128xf32>
    %c0_2 = arith.constant 0 : index
    %c0_3 = arith.constant 0 : index
    %4 = vector.load %arg3[%c0_2, %c0_3] : memref<32x128xbf16, #tpu.memory_space<vmem>>, vector<32x128xbf16>
    %c0_4 = arith.constant 0 : index
    %c0_5 = arith.constant 0 : index
    %5 = vector.load %arg4[%c0_4, %c0_5] : memref<128x128xbf16, #tpu.memory_space<vmem>>, vector<128x128xbf16>
    %cst = arith.constant dense<0.000000e+00> : vector<32x128xf32>
    %6 = tpu.matmul %4, %5, %cst {dimension_numbers = #tpu.dot_dimension_numbers<[1], [0], [0], [1], [0, 0, 1, 1], [], []>} : vector<32x128xbf16>, vector<128x128xbf16>, vector<32x128xf32> -> vector<32x128xf32>
    %7 = arith.addf %3, %6 : vector<32x128xf32>
    %c0_6 = arith.constant 0 : index
    %c0_7 = arith.constant 0 : index
    %8 = vector.load %arg6[%c0_6, %c0_7] : memref<32x128xf32, #tpu.memory_space<vmem>>, vector<32x128xf32>
    tpu.vector_store %arg6[%c0_6, %c0_7], %7 {strides = array<i32>} : memref<32x128xf32, #tpu.memory_space<vmem>>, vector<32x128xf32>,
    %c0_i32_8 = arith.constant 0 : i32
    %9 = arith.cmpi eq, %arg2, %c0_i32_8 : i32
    %10 = arith.extui %9 : i1 to i32
    %c0_i32_9 = arith.constant 0 : i32
    %11 = arith.cmpi ne, %10, %c0_i32_9 : i32
    scf.if %11 {
      %c0_10 = arith.constant 0 : index
      %c0_11 = arith.constant 0 : index
      %12 = vector.load %arg6[%c0_10, %c0_11] : memref<32x128xf32, #tpu.memory_space<vmem>>, vector<32x128xf32>
      %c0_12 = arith.constant 0 : index
      %c0_13 = arith.constant 0 : index
      %13 = vector.load %arg5[%c0_12, %c0_13] : memref<32x128xf32, #tpu.memory_space<vmem>>, vector<32x128xf32>
      tpu.vector_store %arg5[%c0_12, %c0_13], %12 {strides = array<i32>} : memref<32x128xf32, #tpu.memory_space<vmem>>, vector<32x128xf32>,
    } else {
    }
    return
  }
  func.func @transform_0(%arg0: i32, %arg1: i32, %arg2: i32) -> (i32, i32) {
    %c0_i32 = arith.constant 0 : i32
    return %arg0, %arg2 : i32, i32
  }
  func.func @transform_1(%arg0: i32, %arg1: i32, %arg2: i32) -> (i32, i32) {
    %c0_i32 = arith.constant 0 : i32
    return %arg2, %arg1 : i32, i32
  }
  func.func @transform_2(%arg0: i32, %arg1: i32, %arg2: i32) -> (i32, i32) {
    %c0_i32 = arith.constant 0 : i32
    return %arg0, %arg1 : i32, i32
  }
}

</mosaic_0001>

<bundles_post_ra>
// kernel: tpu_custom_call.1
= control target key start
LH: loop header
LB: loop body
LE: loop exit
PB: predicated region body
PF: predicated region fallthrough
CT: control target
= control target key end

     0   :  { %7 = vsyncpa [#allocation4], 0  ;;  %s373_s0 = inlined_call_operand.hbm [shape: bf16[32,128], index: 0, kind: input, shape index: {}]   ;;  %s374_s1 = inlined_call_operand.hbm [shape: bf16[128,128], index: 1, kind: input, shape index: {}]   ;;  %s375_s2 = inlined_call_operand.hbm [shape: f32[32,128], index: 2, kind: output, shape index: {}]  }
   0x1   :  { %8 = vsyncpa [#allocation7], 0 }
   0x2   :  { %9 = vsyncpa [#allocation5], 0  ;;  %s342_s9 = smov [#allocation3]  }
   0x3   :  { %s15_s10 = sshll.u32 %s342_s9, 4  ;;  %s16_s10 = int_to_ptr.vmem [resolvable:$true] %s15_s10 }
   0x4   :  { %s284_s11 = scalar_lea.vmem %s16_s10, 256  ;;  %p289_p1 = scmp.lt.s32.totalorder %s16_s10, %s16_s10 }
   0x5   :  { %p285_p0 = scmp.ne.s32.totalorder %s16_s10, %s284_s11  ;;  %p290_p2 = scmp.lt.s32.totalorder %s284_s11, %s284_s11 }
   0x7   :  { %p291_p3 = por %p290_p2, %p289_p1 }
   0x9   :  { %p292_p4 = pnand %p291_p3, %p285_p0 }
   0xb   :  { %295 = shalt.err (!%p292_p4)
}
   0xc   :  { %s343_s12 = smov 64   ;;  %s344_s13 = smov 4  }
   0xd   :  { %21 = dma.hbm_to_vmem [thread:$0]  %s373_s0, 256, %s16_s10, [#allocation4], %s343_s12, %s343_s12, %s344_s13  }
   0xe   :  { %s345_s16 = smov [#allocation6]  }
   0xf   :  { %s27_s17 = sshll.u32 %s345_s16, 4  ;;  %s28_s17 = int_to_ptr.vmem [resolvable:$true] %s27_s17 }
  0x10   :  { %s304_s18 = scalar_lea.vmem %s28_s17, 1024  ;;  %p309_p6 = scmp.lt.s32.totalorder %s28_s17, %s28_s17 }
  0x11   :  { %p305_p5 = scmp.ne.s32.totalorder %s28_s17, %s304_s18  ;;  %p310_p7 = scmp.lt.s32.totalorder %s304_s18, %s304_s18 }
  0x13   :  { %p311_p8 = por %p310_p7, %p309_p6 }
  0x15   :  { %p312_p9 = pnand %p311_p8, %p305_p5 }
  0x17   :  { %315 = shalt.err (!%p312_p9)
}
  0x18   :  { %33 = dma.hbm_to_vmem [thread:$0]  %s374_s1, 1024, %s28_s17, [#allocation7], %s343_s12, %s343_s12, %s344_s13  }
  0x19   :  { %336 = dma.done.wait [#allocation4], 256  }
  0x1a   :  { %337 = vsyncadd [#allocation4], 4294967040 }
  0x1b   :  { %338 = dma.done.wait [#allocation7], 1024  }
  0x1c   :  { %339 = vsyncadd [#allocation7], 4294966272  ;;  %v266_v0 = vld [vmem:[#allocation6 + $0x38] sm:$0xff]   ;;  %v267_v1 = vld [vmem:[#allocation6 + $0x30] sm:$0xff]   ;;  %s346_s0 = smov [#allocation8]  }
  0x1d   :  { %239 = vmatprep.subr.bf16.mxu0 %v266_v0  ;;  %v268_v2 = vld [vmem:[#allocation6 + $0x28] sm:$0xff]   ;;  %v269_v3 = vld [vmem:[#allocation6 + $0x20] sm:$0xff]   ;;  %v274_v4 = vld [vmem:[#allocation3] sm:$0xff]   ;;  %s206_s1 = sshll.u32 %s346_s0, 4  ;;  %s207_s1 = int_to_ptr.vmem [resolvable:$true] %s206_s1 }
  0x1e   :  { %240 = vmatpush3.bf16.msra.mxu0 %v266_v0  ;;  %255 = vmatprep.mubr.bf16.mxu0 %v274_v4  ;;  %v270_v5 = vld [vmem:[#allocation6 + $0x18] sm:$0xff]   ;;  %v271_v6 = vld [vmem:[#allocation6 + $0x10] sm:$0xff]   ;;  %v272_v7 = vld [vmem:[#allocation6 + $0x8] sm:$0xff]   ;;  %s316_s21 = scalar_lea.vmem %s207_s1, 512  ;;  %p321_p11 = scmp.lt.s32.totalorder %s207_s1, %s207_s1 }
  0x1f   :  { %241 = vmatprep.subr.bf16.mxu0 %v267_v1  ;;  %v273_v8 = vld [vmem:[#allocation6] sm:$0xff]   ;;  %v275_v9 = vld [vmem:[#allocation3 + $0x8] sm:$0xff]   ;;  %p317_p10 = scmp.ne.s32.totalorder %s207_s1, %s316_s21  ;;  %p322_p12 = scmp.lt.s32.totalorder %s316_s21, %s316_s21 }
  0x21   :  { %p323_p13 = por %p322_p12, %p321_p11 }
  0x22   :  { %242 = vmatpush3.bf16.msra.mxu0 %v267_v1 }
  0x23   :  { %243 = vmatprep.subr.bf16.mxu0 %v268_v2  ;;  %p324_p0 = pnand %p323_p13, %p317_p10 }
  0x26   :  { %244 = vmatpush3.bf16.msra.mxu0 %v268_v2 }
  0x27   :  { %245 = vmatprep.subr.bf16.mxu0 %v269_v3 }
  0x2a   :  { %246 = vmatpush3.bf16.msra.mxu0 %v269_v3 }
  0x2b   :  { %247 = vmatprep.subr.bf16.mxu0 %v270_v5 }
  0x2e   :  { %248 = vmatpush3.bf16.msra.mxu0 %v270_v5 }
  0x2f   :  { %249 = vmatprep.subr.bf16.mxu0 %v271_v6 }
  0x32   :  { %250 = vmatpush3.bf16.msra.mxu0 %v271_v6 }
  0x33   :  { %251 = vmatprep.subr.bf16.mxu0 %v272_v7 }
  0x36   :  { %252 = vmatpush3.bf16.msra.mxu0 %v272_v7 }
  0x37   :  { %253 = vmatprep.subr.bf16.mxu0 %v273_v8 }
  0x3a   :  { %254 = vmatpush3.bf16.msra.mxu0 %v273_v8 }
  0x3d   :  { %256 = vmatmul.mubr.bf16.vlgmr.msra.gmra.mxu0 %v275_v9 }
  0xfd   :  { %v257_v10 = vpop.f32.mrf.mxu0 }
  0xfe   :  { %199 = vst [vmem:[#allocation8 + $0x10] sm:$0xff] %v257_v10 }
  0xff   :  { %v167_v11 = vpop.f32.mrf.mxu0 }
 0x100   :  { %197 = vst [vmem:[#allocation8] sm:$0xff] %v167_v11 }
 0x101   :  { %v258_v12 = vpop.f32.mrf.mxu0 }
 0x102   :  { %200 = vst [vmem:[#allocation8 + $0x18] sm:$0xff] %v258_v12 }
 0x103   :  { %v170_v13 = vpop.f32.mrf.mxu0 }
 0x104   :  { %198 = vst [vmem:[#allocation8 + $0x8] sm:$0xff] %v170_v13 }
 0x105   :  { %327 = shalt.err (!%p324_p0)
}
 0x106   :  { %s347_s22 = smov 128   ;;  %s348_s23 = smov 8  }
 0x107   :  { %212 = dma.vmem_to_hbm [thread:$0]  %s207_s1, 512, %s375_s2, [#allocation5], %s347_s22, %s347_s22, %s348_s23  }
 0x108   :  { %340 = dma.done.wait [#allocation5], 512  }
 0x109   :  { %341 = vsyncadd [#allocation5], 4294966784 }
 0x10a   :  { %216 = vsyncpa [#allocation4], 1 }
 0x10b   :  { %217 = vsyncpa [#allocation7], 1 }
 0x10c   :  { %218 = vsyncpa [#allocation5], 1 }

</bundles_post_ra>
